<compile_context>
chip_gen: v6e
topology: v6e:2x2x1
jax: 0.10.0
libtpu: 0.0.40
codegen_flags: <defaults>
</compile_context>

<pallas_src>
import numpy as np
import jax
import jax.numpy as jnp
from jax.experimental import pallas as pl
from jax.experimental.pallas import tpu as pltpu


def make_relative_position_index(window_size):
    """Mirror of the torch index construction in RelativePositionBias.__init__."""
    Wh, Ww = window_size
    num_relative_distance = (2 * Wh - 1) * (2 * Ww - 1) + 3
    coords_h = np.arange(Wh)
    coords_w = np.arange(Ww)
    coords = np.stack(np.meshgrid(coords_h, coords_w, indexing="ij"))   # (2, Wh, Ww)
    coords_flatten = coords.reshape(2, -1)                              # (2, Wh*Ww)
    relative_coords = coords_flatten[:, :, None] - coords_flatten[:, None, :]
    relative_coords = relative_coords.transpose(1, 2, 0).copy()         # (Wh*Ww, Wh*Ww, 2)
    relative_coords[:, :, 0] += Wh - 1
    relative_coords[:, :, 1] += Ww - 1
    relative_coords[:, :, 0] *= 2 * Ww - 1
    N = Wh * Ww + 1
    rpi = np.zeros((N, N), dtype=np.int64)
    rpi[1:, 1:] = relative_coords.sum(-1)
    rpi[0, 0:] = num_relative_distance - 3
    rpi[0:, 0] = num_relative_distance - 2
    rpi[0, 0] = num_relative_distance - 1
    return rpi.astype(np.int32), num_relative_distance


def _rpb_gather_kernel(idx_ref, table_t_ref, out_ref):
    # idx_ref:     (1, TN)  int32   — lane-major tile of flattened rel-pos index
    # table_t_ref: (H, D)   float32 — transposed bias table, resident across grid
    # out_ref:     (H, TN)  float32 — lane-dense output tile (heads on sublanes)
    d = table_t_ref.shape[1]
    tn = idx_ref.shape[1]
    idx = idx_ref[...]                                            # (1, TN)
    rows = jax.lax.broadcasted_iota(jnp.int32, (d, tn), 0)        # (D, TN)
    onehot = (rows == idx).astype(table_t_ref.dtype)              # (D, TN), 0/1
    # (H, D) @ (D, TN) -> (H, TN).  Exact: each output elem is one product x*1.0.
    out_ref[...] = jnp.dot(table_t_ref[...], onehot,
                           preferred_element_type=jnp.float32)


def _round_up(x, m):
    return ((x + m - 1) // m) * m


def relative_position_bias(table, relative_position_index, window_size, *, tile_n=512):
    """Forward pass of RelativePositionBias. Returns (num_heads, N, N) float32."""
    Wh, Ww = window_size
    N = Wh * Ww + 1
    D, H = table.shape
    nn = N * N

    # Lane tile over N*N: multiple of 128, sized for v7x's smaller VMEM.
    tn = min(tile_n, _round_up(nn, 128))
    nn_pad = _round_up(nn, tn)

    # Lane-major flattened index, zero-padded (index 0 is a valid table row;
    # the padded columns are sliced off below).
    idx_flat = relative_position_index.reshape(-1).astype(jnp.int32)
    idx_flat = jnp.pad(idx_flat, (0, nn_pad - nn))[None, :]        # (1, nn_pad)

    # Tiny (H, D) transposed table — cheap wrapper-side prep, resident in VMEM.
    table_t = table.astype(jnp.float32).T                          # (H, D)

    out = pl.pallas_call(
        _rpb_gather_kernel,
        out_shape=jax.ShapeDtypeStruct((H, nn_pad), jnp.float32),
        grid=(nn_pad // tn,),
        in_specs=[
            pl.BlockSpec((1, tn), lambda i: (0, i)),               # index tile
            pl.BlockSpec((H, D), lambda i: (0, 0)),                # table (resident)
        ],
        out_specs=pl.BlockSpec((H, tn), lambda i: (0, i)),
        compiler_params=pltpu.CompilerParams(
            dimension_semantics=("parallel",)),
    )(idx_flat, table_t)

    # Glue: drop padding, reshape.  No transpose needed — kernel emitted (H, N*N).
    return out[:, :nn].reshape(H, N, N)


if __name__ == "__main__":
    window_size = (4, 4)   # small, forward-consistent shape: N = 17
    num_heads = 8

    rpi_np, num_relative_distance = make_relative_position_index(window_size)

    # Deterministic (non-zero) parameter init so the output is non-trivial.
    key = jax.random.PRNGKey(0)
    table = jax.random.normal(key, (num_relative_distance, num_heads), dtype=jnp.float32)

    rpi = jnp.asarray(rpi_np)

    out = relative_position_bias(table, rpi, window_size)
    out = jax.block_until_ready(out)

    # Pure-JAX reference (matches the torch forward exactly).
    N = window_size[0] * window_size[1] + 1
    ref = jnp.take(table, rpi.reshape(-1), axis=0).reshape(N, N, num_heads)
    ref = jnp.transpose(ref, (2, 0, 1))

    np.testing.assert_allclose(np.asarray(out), np.asarray(ref), rtol=1e-6, atol=1e-6)
    assert out.shape == (num_heads, N, N)
    print("KERNEL_OK")
</pallas_src>

<mosaic_0001>
module attributes {stable_mosaic.version = 11 : i64} {
  func.func @_rpb_gather_kernel(%arg0: i32, %arg1: memref<1x384xi32, #tpu.memory_space<vmem>>, %arg2: memref<8x52xf32, #tpu.memory_space<vmem>>, %arg3: memref<8x384xf32, #tpu.memory_space<vmem>>) attributes {dimension_semantics = [#tpu.dimension_semantics<parallel>], iteration_bounds = array<i64: 1>, scalar_prefetch = 0 : i64, scratch_operands = 0 : i64, tpu.core_type = #tpu.core_type<tc>, window_params = [{transform_indices = @transform_0, window_bounds = array<i64: 1, 384>}, {pipeline_mode = #tpu.pipeline_mode<synchronous>, transform_indices = @transform_1, window_bounds = array<i64: 8, 52>}, {transform_indices = @transform_2, window_bounds = array<i64: 8, 384>}]} {
    %c0 = arith.constant 0 : index
    %c0_0 = arith.constant 0 : index
    %0 = vector.load %arg1[%c0, %c0_0] : memref<1x384xi32, #tpu.memory_space<vmem>>, vector<1x384xi32>
    %1 = tpu.iota {dimensions = array<i32: 0>} : vector<52x384xi32>
    %2 = vector.broadcast %0 : vector<1x384xi32> to vector<52x384xi32>
    %3 = arith.cmpi eq, %1, %2 : vector<52x384xi32>
    %4 = arith.extui %3 : vector<52x384xi1> to vector<52x384xi32>
    %5 = arith.sitofp %4 : vector<52x384xi32> to vector<52x384xf32>
    %c0_1 = arith.constant 0 : index
    %c0_2 = arith.constant 0 : index
    %6 = vector.load %arg2[%c0_1, %c0_2] : memref<8x52xf32, #tpu.memory_space<vmem>>, vector<8x52xf32>
    %cst = arith.constant dense<0.000000e+00> : vector<8x384xf32>
    %7 = tpu.matmul %6, %5, %cst {dimension_numbers = #tpu.dot_dimension_numbers<[1], [0], [0], [1], [0, 0, 1, 1], [], []>} : vector<8x52xf32>, vector<52x384xf32>, vector<8x384xf32> -> vector<8x384xf32>
    %c0_3 = arith.constant 0 : index
    %c0_4 = arith.constant 0 : index
    %8 = vector.load %arg3[%c0_3, %c0_4] : memref<8x384xf32, #tpu.memory_space<vmem>>, vector<8x384xf32>
    tpu.vector_store %arg3[%c0_3, %c0_4], %7 {strides = array<i32>} : memref<8x384xf32, #tpu.memory_space<vmem>>, vector<8x384xf32>,
    return
  }
  func.func @transform_0(%arg0: i32) -> (i32, i32) {
    %c0_i32 = arith.constant 0 : i32
    %c0_i32_0 = arith.constant 0 : i32
    return %c0_i32, %arg0 : i32, i32
  }
  func.func @transform_1(%arg0: i32) -> (i32, i32) {
    %c0_i32 = arith.constant 0 : i32
    %c0_i32_0 = arith.constant 0 : i32
    %c0_i32_1 = arith.constant 0 : i32
    return %c0_i32, %c0_i32_0 : i32, i32
  }
  func.func @transform_2(%arg0: i32) -> (i32, i32) {
    %c0_i32 = arith.constant 0 : i32
    %c0_i32_0 = arith.constant 0 : i32
    return %c0_i32, %arg0 : i32, i32
  }
}

</mosaic_0001>

<bundles_post_ra>
// kernel: tpu_custom_call.1
= control target key start
LH: loop header
LB: loop body
LE: loop exit
PB: predicated region body
PF: predicated region fallthrough
CT: control target
= control target key end

     0   :  { %7 = vsyncpa [#allocation3], 0  ;;  %s492_s0 = inlined_call_operand.hbm [shape: s32[1,384], index: 0, kind: input, shape index: {}]   ;;  %s493_s1 = inlined_call_operand.hbm [shape: f32[8,52], index: 1, kind: input, shape index: {}]   ;;  %s494_s2 = inlined_call_operand.hbm [shape: f32[8,384], index: 2, kind: output, shape index: {}]  }
   0x1   :  { %8 = vsyncpa [#allocation6], 0 }
   0x2   :  { %9 = vsyncpa [#allocation4], 0  ;;  %s436_s9 = smov [#allocation2]   ;;  %s437_s11 = smov [#allocation5]  }
   0x3   :  { %s16_s10 = sshll.u32 %s436_s9, 4  ;;  %s26_s12 = sshll.u32 %s437_s11, 4  ;;  %s17_s10 = int_to_ptr.vmem [resolvable:$true] %s16_s10  ;;  %s27_s12 = int_to_ptr.vmem [resolvable:$true] %s26_s12 }
   0x4   :  { %s378_s13 = scalar_lea.vmem %s17_s10, 48  ;;  %s382_s14 = scalar_lea.vmem %s17_s10, 64 }
   0x5   :  { %p379_p0 = scmp.ne.s32.totalorder %s17_s10, %s378_s13  ;;  %p383_p1 = scmp.lt.s32.totalorder %s17_s10, %s17_s10 }
   0x6   :  { %p384_p2 = scmp.lt.s32.totalorder %s382_s14, %s378_s13 }
   0x8   :  { %p385_p3 = por %p384_p2, %p383_p1 }
   0xa   :  { %p386_p4 = pnand %p385_p3, %p379_p0 }
   0xc   :  { %389 = shalt.err (!%p386_p4)
}
   0xd   :  { %19 = dma.hbm_to_vmem [thread:$0]  %s492_s0, 48, %s17_s10, [#allocation3]  }
   0xe   :  { %s398_s17 = scalar_lea.vmem %s27_s12, 128  ;;  %p403_p6 = scmp.lt.s32.totalorder %s27_s12, %s27_s12 }
   0xf   :  { %p399_p5 = scmp.ne.s32.totalorder %s27_s12, %s398_s17  ;;  %p404_p7 = scmp.lt.s32.totalorder %s398_s17, %s398_s17 }
  0x11   :  { %p405_p8 = por %p404_p7, %p403_p6 }
  0x13   :  { %p406_p9 = pnand %p405_p8, %p399_p5 }
  0x15   :  { %409 = shalt.err (!%p406_p9)
}
  0x16   :  { %29 = dma.hbm_to_vmem [thread:$0]  %s493_s1, 128, %s27_s12, [#allocation6]  }
  0x17   :  { %430 = dma.done.wait [#allocation3], 48  }
  0x18   :  { %431 = vsyncadd [#allocation3], 4294967248 }
  0x19   :  { %432 = dma.done.wait [#allocation6], 128  }
  0x1a   :  { %433 = vsyncadd [#allocation6], 4294967168  ;;  %v37_v0 = vlaneseq  ;;  %v438_v1 = vmov 0.0   ;;  %vm439_vm0 = vmmov 0   ;;  %v36_v7 = vld [vmem:[#allocation2] sm:$0x7] }
  0x1b   :  { %347 = vmatprep.subr.mxu1 %v438_v1  ;;  %199 = vmatprep.mubr.f32.mxu0 %v438_v1  ;;  %vm125_vm1 = vcmask 1043456   ;;  %v440_v18 = vmov 1.0   ;;  %v120_v20 = vld [vmem:[#allocation5] sm:$0xff]  ;;  %s441_s0 = smov [#allocation7]  }
  0x1c   :  { %v465_v2 = vshrl.u32 %v37_v0, 7  ;;  %361 = vmatprep.mubr.msk.f32.mxu1 %vm439_vm0, %v438_v1  ;;  %s285_s1 = sshll.u32 %s441_s0, 4  ;;  %s286_s1 = int_to_ptr.vmem [resolvable:$true] %s285_s1 }
  0x1d   :  { %s410_s20 = scalar_lea.vmem %s286_s1, 384  ;;  %p415_p11 = scmp.lt.s32.totalorder %s286_s1, %s286_s1 }
  0x1e   :  { %v51_v3 = vsub.s32 1, %v465_v2  ;;  %v47_v4 = vsub.s32 0, %v465_v2  ;;  %v55_v5 = vsub.s32 2, %v465_v2  ;;  %v44_v6 = vadd.s32 48, %v465_v2  ;;  %p411_p10 = scmp.ne.s32.totalorder %s286_s1, %s410_s20  ;;  %p416_p12 = scmp.lt.s32.totalorder %s410_s20, %s410_s20 }
  0x1f   :  { %v43_v8 = vadd.s32 40, %v465_v2  ;;  %v42_v12 = vadd.s32 32, %v465_v2  ;;  %v41_v13 = vadd.s32 24, %v465_v2  ;;  %v40_v17 = vadd.s32 16, %v465_v2 }
  0x20   :  { %v52_v9 = vrot.slane %v36_v7, %v51_v3  ;;  %v48_v10 = vrot.slane %v36_v7, %v47_v4  ;;  %v56_v11 = vrot.slane %v36_v7, %v55_v5  ;;  %v39_v19 = vadd.s32 8, %v465_v2  ;;  %p417_p13 = por %p416_p12, %p415_p11 }
  0x22   :  { %vm76_vm2 = vcmp.eq.s32.totalorder %v44_v6, %v52_v9  ;;  %vm75_vm3 = vcmp.eq.s32.totalorder %v44_v6, %v48_v10  ;;  %vm77_vm4 = vcmp.eq.s32.totalorder %v44_v6, %v56_v11  ;;  %vm73_vm5 = vcmp.eq.s32.totalorder %v43_v8, %v52_v9  ;;  %p418_p0 = pnand %p417_p13, %p411_p10 }
  0x23   :  { %v314_v14 = vsel %vm76_vm2, 1.0, %v438_v1  ;;  %v313_v15 = vsel %vm75_vm3, 1.0, %v438_v1  ;;  %v315_v16 = vsel %vm77_vm4, 1.0, %v438_v1  ;;  %vm72_vm6 = vcmp.eq.s32.totalorder %v43_v8, %v48_v10 }
  0x24   :  { %316 = vmatprep.subr.msk.mxu0 %vm125_vm1, %v314_v14  ;;  %348 = vmatpush3.msk.msra.mxu1 %vm125_vm1, %v315_v16  ;;  %vm74_vm7 = vcmp.eq.s32.totalorder %v43_v8, %v56_v11  ;;  %vm70_vm8 = vcmp.eq.s32.totalorder %v42_v12, %v52_v9  ;;  %vm71_vm9 = vcmp.eq.s32.totalorder %v42_v12, %v56_v11 }
  0x25   :  { %317 = vmatpush1.msk.msra.mxu0 %vm125_vm1, %v313_v15  ;;  %349 = vmatprep.subr.mxu1 %v438_v1  ;;  %vm69_vm10 = vcmp.eq.s32.totalorder %v42_v12, %v48_v10  ;;  %vm67_vm11 = vcmp.eq.s32.totalorder %v41_v13, %v52_v9  ;;  %vm68_vm12 = vcmp.eq.s32.totalorder %v41_v13, %v56_v11 }
  0x26   :  { %318 = vmatprep.subr.msk.mxu0 %vm73_vm5, %v440_v18  ;;  %350 = vmatpush3.msk.msra.mxu1 %vm74_vm7, %v440_v18  ;;  %vm66_vm13 = vcmp.eq.s32.totalorder %v41_v13, %v48_v10  ;;  %vm64_vm14 = vcmp.eq.s32.totalorder %v40_v17, %v52_v9  ;;  %vm65_vm15 = vcmp.eq.s32.totalorder %v40_v17, %v56_v11  ;;  %vm121_vm7 = vcmask 424960  }
  0x27   :  { %319 = vmatpush1.msk.msra.mxu0 %vm72_vm6, %v440_v18  ;;  %351 = vmatprep.subr.mxu1 %v438_v1  ;;  %vm63_vm0 = vcmp.eq.s32.totalorder %v40_v17, %v48_v10  ;;  %vm61_vm1 = vcmp.eq.s32.totalorder %v39_v19, %v52_v9  ;;  %vm62_vm2 = vcmp.eq.s32.totalorder %v39_v19, %v56_v11 }
  0x28   :  { %320 = vmatprep.subr.msk.mxu0 %vm70_vm8, %v440_v18  ;;  %352 = vmatpush3.msk.msra.mxu1 %vm71_vm9, %v440_v18  ;;  %vm60_vm3 = vcmp.eq.s32.totalorder %v39_v19, %v48_v10  ;;  %vm58_vm4 = vcmp.eq.s32.totalorder %v465_v2, %v52_v9  ;;  %vm59_vm5 = vcmp.eq.s32.totalorder %v465_v2, %v56_v11 }
  0x29   :  { %321 = vmatpush1.msk.msra.mxu0 %vm69_vm10, %v440_v18  ;;  %353 = vmatprep.subr.mxu1 %v438_v1  ;;  %vm57_vm6 = vcmp.eq.s32.totalorder %v465_v2, %v48_v10 }
  0x2a   :  { %322 = vmatprep.subr.msk.mxu0 %vm67_vm11, %v440_v18  ;;  %354 = vmatpush3.msk.msra.mxu1 %vm68_vm12, %v440_v18 }
  0x2b   :  { %323 = vmatpush1.msk.msra.mxu0 %vm66_vm13, %v440_v18  ;;  %355 = vmatprep.subr.mxu1 %v438_v1 }
  0x2c   :  { %324 = vmatprep.subr.msk.mxu0 %vm64_vm14, %v440_v18  ;;  %356 = vmatpush3.msk.msra.mxu1 %vm65_vm15, %v440_v18 }
  0x2d   :  { %325 = vmatpush1.msk.msra.mxu0 %vm63_vm0, %v440_v18  ;;  %357 = vmatprep.subr.mxu1 %v438_v1 }
  0x2e   :  { %326 = vmatprep.subr.msk.mxu0 %vm61_vm1, %v440_v18  ;;  %358 = vmatpush3.msk.msra.mxu1 %vm62_vm2, %v440_v18 }
  0x2f   :  { %327 = vmatpush1.msk.msra.mxu0 %vm60_vm3, %v440_v18  ;;  %359 = vmatprep.subr.mxu1 %v438_v1 }
  0x30   :  { %328 = vmatprep.subr.msk.mxu0 %vm58_vm4, %v440_v18  ;;  %360 = vmatpush3.msk.msra.mxu1 %vm59_vm5, %v440_v18 }
  0x31   :  { %329 = vmatpush1.msk.msra.mxu0 %vm57_vm6, %v440_v18  ;;  %362 = vmatmul.mubr.msk.f32.vlgmr.msra.gmra.mxu1 %vm121_vm7, %v120_v20 }
  0x32   :  { %330 = vmatmul.mubr.msk.f32.vlgmr.msra.gmra.mxu0 %vm121_vm7, %v120_v20 }
  0xf1   :  { %v272_v21 = vpop.f32.mrf.mxu1 }
  0xf2   :  { %v201_v22 = vpop.f32.mrf.mxu0  ;;  %278 = vst [vmem:[#allocation7 + $0x10] sm:$0xff] %v272_v21 }
  0xf3   :  { %276 = vst [vmem:[#allocation7] sm:$0xff] %v201_v22  ;;  %v363_v23 = vpop.f32.mrf.mxu1 }
  0xf4   :  { %v203_v24 = vpop.f32.mrf.mxu0 }
  0xf5   :  { %277 = vst [vmem:[#allocation7 + $0x8] sm:$0xff] %v203_v24 }
  0xf6   :  { %421 = shalt.err (!%p418_p0)
}
  0xf7   :  { %288 = dma.vmem_to_hbm [thread:$0]  %s286_s1, 384, %s494_s2, [#allocation4]  }
  0xf8   :  { %434 = dma.done.wait [#allocation4], 384  }
  0xf9   :  { %435 = vsyncadd [#allocation4], 4294966912 }
  0xfa   :  { %292 = vsyncpa [#allocation3], 1 }
  0xfb   :  { %293 = vsyncpa [#allocation6], 1 }
  0xfc   :  { %294 = vsyncpa [#allocation4], 1 }

</bundles_post_ra>
